<compile_context>
chip_gen: v5e
topology: v5e:2x2
jax: 0.10.0
libtpu: 0.0.40
codegen_flags: <defaults>
</compile_context>

<pallas_src>
import jax
import jax.numpy as jnp
from jax import lax
from jax.experimental import pallas as pl
from jax.experimental.pallas import tpu as pltpu

EPS = 1e-5


def _patch_embed_ln_kernel(x_ref, gamma_ref, beta_ref, o_ref):
    # x_ref: (1, C, TN) tile in the native NCHW-flattened layout
    #        (C on sublanes, tokens on lanes).
    # o_ref: (1, TN, C) token-major tile of the final output.
    x_cn = x_ref[0].astype(jnp.float32)                      # (C, TN)

    # LayerNorm statistics in the pre-transpose layout: reducing over C (the
    # sublane axis) is cheap VPU work, keeping the XLU free for the single
    # transpose below.  All broadcasts are sublane broadcasts (row vectors).
    inv_c = 1.0 / x_cn.shape[0]
    mean = jnp.sum(x_cn, axis=0, keepdims=True) * inv_c      # (1, TN)
    centered = x_cn - mean
    var = jnp.sum(centered * centered, axis=0, keepdims=True) * inv_c
    normalized = centered * lax.rsqrt(var + EPS)             # (C, TN)

    # One XLU transpose of the already-normalized tile, then a sublane-broadcast
    # affine in token-major layout.
    # TODO(synk): for bf16 inputs a packed bf16 transpose (before upcast) would
    # halve the XLU traffic; kept in f32 here to preserve f32 affine numerics.
    y = jnp.transpose(normalized, (1, 0)) * gamma_ref[...] + beta_ref[...]
    o_ref[0] = y.astype(o_ref.dtype)


def _vmem_limit_bytes():
    """Per-chip VMEM limit: ~64 MiB on 128 MiB parts, ~38 MiB on 64 MiB parts."""
    default = 32 * 1024 * 1024
    try:
        cap = getattr(pltpu.get_tpu_info(), "vmem_capacity_bytes", None)
    except Exception:
        return default
    if not cap:
        return default
    return min(cap * 3 // 5, 64 * 1024 * 1024)


def _choose_token_tile(n_tokens, embed_dim, itemsize, vmem_limit_bytes):
    """Lane-aligned token tile that divides N, sized for VMEM and grid depth.

    Returns None if no suitable tile exists (caller falls back to fused XLA).
    """
    # True per-token VMEM footprint:
    #   double-buffered input tile  : 2 * C * itemsize
    #   double-buffered output tile : 2 * C * itemsize
    #   in-kernel f32 temporaries (x_cn, centered, normalized, y): ~4 * C * 4
    per_token = embed_dim * (4 * itemsize + 16)
    budget = min(vmem_limit_bytes // 2, 8 * 1024 * 1024)
    cap = min(2048, budget // per_token)
    if cap < 128:
        return None
    candidates = [t for t in range(128, int(cap) + 1, 128) if n_tokens % t == 0]
    if not candidates:
        return None
    # Prefer tiles that keep the token-axis grid deep enough to pipeline DMAs
    # and shard across both v7x TensorCores even when B == 1.
    for min_steps in (8, 2, 1):
        ok = [t for t in candidates if n_tokens // t >= min_steps]
        if ok:
            return max(ok)
    return candidates[0]


def _xla_fallback(x_nchw, gamma, beta):
    B, C, H, W = x_nchw.shape
    x = jnp.transpose(x_nchw.reshape(B, C, H * W), (0, 2, 1)).astype(jnp.float32)
    mean = jnp.mean(x, axis=-1, keepdims=True)
    var = jnp.mean((x - mean) ** 2, axis=-1, keepdims=True)
    y = (x - mean) * lax.rsqrt(var + EPS) * gamma + beta
    return y.astype(x_nchw.dtype)


def patch_embed_forward(x_nchw, gamma=None, beta=None, *, use_pallas=None):
    """HAT PatchEmbed forward: (B, C, H, W) -> (B, H*W, C), optional LayerNorm."""
    B, C, H, W = x_nchw.shape
    N = H * W

    if gamma is None:
        # norm_layer=None: forward is just flatten(2).transpose(1, 2).
        return jnp.transpose(x_nchw.reshape(B, C, N), (0, 2, 1))

    if use_pallas is None:
        # Below a few hundred KiB launch + per-step overhead loses to fused XLA.
        use_pallas = x_nchw.size * x_nchw.dtype.itemsize >= (512 * 1024)

    vmem_limit = _vmem_limit_bytes()
    tn = None
    if use_pallas:
        tn = _choose_token_tile(N, C, x_nchw.dtype.itemsize, vmem_limit)
    if tn is None:
        return _xla_fallback(x_nchw, gamma, beta)

    # Native NCHW-flattened layout: a free reshape, no HBM transpose.
    x_cn = x_nchw.reshape(B, C, N)
    gamma2 = gamma.reshape(1, C).astype(jnp.float32)
    beta2 = beta.reshape(1, C).astype(jnp.float32)

    grid = (B, N // tn)
    itemsize = x_nchw.dtype.itemsize
    cost = pl.CostEstimate(
        flops=8 * B * N * C,                 # mean/var/normalize/affine
        transcendentals=B * N,               # one rsqrt per token
        bytes_accessed=2 * B * N * C * itemsize + 2 * C * 4,
    )

    # TODO(synk): for embed_dim not a multiple of 128 (e.g. HAT's C=180) the
    # output rows end in masked stores; a flattened (B, N*C) lane-dense out_spec
    # with tn*C % 128 == 0 would remove them if store bandwidth shows up in
    # profiles.
    return pl.pallas_call(
        _patch_embed_ln_kernel,
        out_shape=jax.ShapeDtypeStruct((B, N, C), x_nchw.dtype),
        grid_spec=pltpu.PrefetchScalarGridSpec(
            num_scalar_prefetch=0,
            grid=grid,
            in_specs=[
                pl.BlockSpec((1, C, tn), lambda b, t: (b, 0, t)),
                pl.BlockSpec((1, C), lambda b, t: (0, 0)),
                pl.BlockSpec((1, C), lambda b, t: (0, 0)),
            ],
            out_specs=pl.BlockSpec((1, tn, C), lambda b, t: (b, t, 0)),
        ),
        compiler_params=pltpu.CompilerParams(
            dimension_semantics=("parallel", "parallel"),
            vmem_limit_bytes=vmem_limit,
        ),
        cost_estimate=cost,
    )(x_cn, gamma2, beta2)


def _reference(x_nchw, gamma, beta):
    B, C, H, W = x_nchw.shape
    x = jnp.transpose(x_nchw.reshape(B, C, H * W), (0, 2, 1)).astype(jnp.float32)
    mean = jnp.mean(x, axis=-1, keepdims=True)
    var = jnp.mean((x - mean) ** 2, axis=-1, keepdims=True)
    return ((x - mean) / jnp.sqrt(var + EPS) * gamma + beta).astype(x_nchw.dtype)


if __name__ == "__main__":
    key = jax.random.PRNGKey(0)

    # Main test: default embed_dim=96 channels, 16x16 spatial (256 tokens), batch=2.
    B, C, H, W = 2, 96, 16, 16
    kx, kg, kb, kx2, kg2, kb2 = jax.random.split(key, 6)
    x = jax.random.normal(kx, (B, C, H, W), dtype=jnp.float32)
    gamma = 1.0 + 0.1 * jax.random.normal(kg, (C,), dtype=jnp.float32)
    beta = 0.1 * jax.random.normal(kb, (C,), dtype=jnp.float32)

    # Force the Pallas path (the size heuristic would route this tiny test to XLA).
    out = jax.block_until_ready(patch_embed_forward(x, gamma, beta, use_pallas=True))
    ref = _reference(x, gamma, beta)
    assert out.shape == (B, H * W, C)
    assert jnp.allclose(out, ref, atol=1e-5, rtol=1e-5), float(
        jnp.max(jnp.abs(out.astype(jnp.float32) - ref.astype(jnp.float32)))
    )

    # HAT's real embed_dim (C=180, not a multiple of 128): exercises the
    # masked-tail-store path the C=96/128 configs hide.
    B2, C2, H2, W2 = 1, 180, 16, 16
    x2 = jax.random.normal(kx2, (B2, C2, H2, W2), dtype=jnp.float32)
    gamma2 = 1.0 + 0.1 * jax.random.normal(kg2, (C2,), dtype=jnp.float32)
    beta2 = 0.1 * jax.random.normal(kb2, (C2,), dtype=jnp.float32)
    out2 = jax.block_until_ready(
        patch_embed_forward(x2, gamma2, beta2, use_pallas=True))
    ref2 = _reference(x2, gamma2, beta2)
    assert out2.shape == (B2, H2 * W2, C2)
    assert jnp.allclose(out2, ref2, atol=1e-5, rtol=1e-5), float(
        jnp.max(jnp.abs(out2.astype(jnp.float32) - ref2.astype(jnp.float32)))
    )

    # norm_layer=None path: pure flatten(2).transpose(1, 2).
    out_nonorm = jax.block_until_ready(patch_embed_forward(x))
    ref_nonorm = jnp.transpose(x.reshape(B, C, H * W), (0, 2, 1))
    assert jnp.allclose(out_nonorm, ref_nonorm)

    print("KERNEL_OK")
</pallas_src>

<mosaic_0001>
module attributes {stable_mosaic.version = 11 : i64} {
  func.func @_patch_embed_ln_kernel(%arg0: i32, %arg1: i32, %arg2: memref<1x96x128xf32, #tpu.memory_space<vmem>>, %arg3: memref<1x96xf32, #tpu.memory_space<vmem>>, %arg4: memref<1x96xf32, #tpu.memory_space<vmem>>, %arg5: memref<1x128x96xf32, #tpu.memory_space<vmem>>) attributes {dimension_semantics = [#tpu.dimension_semantics<parallel>, #tpu.dimension_semantics<parallel>], iteration_bounds = array<i64: 2, 2>, scalar_prefetch = 0 : i64, scratch_operands = 0 : i64, tpu.core_type = #tpu.core_type<tc>, window_params = [{transform_indices = @transform_0, window_bounds = array<i64: 1, 96, 128>}, {pipeline_mode = #tpu.pipeline_mode<synchronous>, transform_indices = @transform_1, window_bounds = array<i64: 1, 96>}, {pipeline_mode = #tpu.pipeline_mode<synchronous>, transform_indices = @transform_2, window_bounds = array<i64: 1, 96>}, {transform_indices = @transform_3, window_bounds = array<i64: 1, 128, 96>}]} {
    %c0 = arith.constant 0 : index
    %c0_0 = arith.constant 0 : index
    %c0_1 = arith.constant 0 : index
    %0 = vector.load %arg2[%c0, %c0_0, %c0_1] : memref<1x96x128xf32, #tpu.memory_space<vmem>>, vector<1x96x128xf32>
    %1 = vector.shape_cast %0 : vector<1x96x128xf32> to vector<96x128xf32>
    %cst = arith.constant dense<0.000000e+00> : vector<128xf32>
    %2 = vector.multi_reduction <add>, %1, %cst [0] : vector<96x128xf32> to vector<128xf32>
    %3 = vector.shape_cast %2 : vector<128xf32> to vector<1x128xf32>
    %cst_2 = arith.constant 0.010416667 : f32
    %4 = vector.broadcast %cst_2 : f32 to vector<1x128xf32>
    %5 = arith.mulf %3, %4 : vector<1x128xf32>
    %6 = vector.broadcast %5 : vector<1x128xf32> to vector<96x128xf32>
    %7 = arith.subf %1, %6 : vector<96x128xf32>
    %8 = arith.mulf %7, %7 : vector<96x128xf32>
    %cst_3 = arith.constant dense<0.000000e+00> : vector<128xf32>
    %9 = vector.multi_reduction <add>, %8, %cst_3 [0] : vector<96x128xf32> to vector<128xf32>
    %10 = vector.shape_cast %9 : vector<128xf32> to vector<1x128xf32>
    %cst_4 = arith.constant 0.010416667 : f32
    %11 = vector.broadcast %cst_4 : f32 to vector<1x128xf32>
    %12 = arith.mulf %10, %11 : vector<1x128xf32>
    %cst_5 = arith.constant 9.99999974E-6 : f32
    %13 = vector.broadcast %cst_5 : f32 to vector<1x128xf32>
    %14 = arith.addf %12, %13 : vector<1x128xf32>
    %15 = math.rsqrt %14 : vector<1x128xf32>
    %16 = vector.broadcast %15 : vector<1x128xf32> to vector<96x128xf32>
    %17 = arith.mulf %7, %16 : vector<96x128xf32>
    %18 = tpu.transpose %17, [1, 0] : vector<96x128xf32> -> vector<128x96xf32>
    %c0_6 = arith.constant 0 : index
    %c0_7 = arith.constant 0 : index
    %19 = vector.load %arg3[%c0_6, %c0_7] : memref<1x96xf32, #tpu.memory_space<vmem>>, vector<1x96xf32>
    %20 = vector.broadcast %19 : vector<1x96xf32> to vector<128x96xf32>
    %21 = arith.mulf %18, %20 : vector<128x96xf32>
    %c0_8 = arith.constant 0 : index
    %c0_9 = arith.constant 0 : index
    %22 = vector.load %arg4[%c0_8, %c0_9] : memref<1x96xf32, #tpu.memory_space<vmem>>, vector<1x96xf32>
    %23 = vector.broadcast %22 : vector<1x96xf32> to vector<128x96xf32>
    %24 = arith.addf %21, %23 : vector<128x96xf32>
    %c0_10 = arith.constant 0 : index
    %c0_11 = arith.constant 0 : index
    %c0_12 = arith.constant 0 : index
    %25 = vector.load %arg5[%c0_10, %c0_11, %c0_12] : memref<1x128x96xf32, #tpu.memory_space<vmem>>, vector<1x128x96xf32>
    %26 = vector.shape_cast %25 : vector<1x128x96xf32> to vector<128x96xf32>
    %27 = vector.shape_cast %24 : vector<128x96xf32> to vector<1x128x96xf32>
    tpu.vector_store %arg5[%c0_10, %c0_11, %c0_12], %27 {strides = array<i32>} : memref<1x128x96xf32, #tpu.memory_space<vmem>>, vector<1x128x96xf32>,
    return
  }
  func.func @transform_0(%arg0: i32, %arg1: i32) -> (i32, i32, i32) {
    %c0_i32 = arith.constant 0 : i32
    %c0_i32_0 = arith.constant 0 : i32
    return %arg0, %c0_i32, %arg1 : i32, i32, i32
  }
  func.func @transform_1(%arg0: i32, %arg1: i32) -> (i32, i32) {
    %c0_i32 = arith.constant 0 : i32
    %c0_i32_0 = arith.constant 0 : i32
    %c0_i32_1 = arith.constant 0 : i32
    return %c0_i32, %c0_i32_0 : i32, i32
  }
  func.func @transform_2(%arg0: i32, %arg1: i32) -> (i32, i32) {
    %c0_i32 = arith.constant 0 : i32
    %c0_i32_0 = arith.constant 0 : i32
    %c0_i32_1 = arith.constant 0 : i32
    return %c0_i32, %c0_i32_0 : i32, i32
  }
  func.func @transform_3(%arg0: i32, %arg1: i32) -> (i32, i32, i32) {
    %c0_i32 = arith.constant 0 : i32
    %c0_i32_0 = arith.constant 0 : i32
    return %arg0, %arg1, %c0_i32 : i32, i32, i32
  }
}

</mosaic_0001>

<bundles_post_ra>
// kernel: tpu_custom_call.1
= control target key start
LH: loop header
LB: loop body
LE: loop exit
PB: predicated region body
PF: predicated region fallthrough
CT: control target
= control target key end

     0   :  { %s1003_s0 = inlined_call_operand.hbm [shape: f32[2,96,256], index: 0, kind: input, shape index: {}]   ;;  %s1004_s1 = inlined_call_operand.hbm [shape: f32[1,96], index: 1, kind: input, shape index: {}]   ;;  %s1005_s2 = inlined_call_operand.vmem [shape: f32[1,96], index: 2, kind: input, shape index: {}]   ;;  %s1006_s3 = inlined_call_operand.vmem [shape: f32[2,256,96], index: 3, kind: output, shape index: {}]  }
   0x1   :  { %1009 = sst [smem:[#allocation10_spill]] %s1004_s1 }
   0x2   :  { %1010 = sst [smem:[#allocation11_spill]] %s1006_s3 }
   0x3   :  { %8 = vsyncpa [#allocation3], 0 }
   0x4   :  { %10 = vsyncpa [#allocation3 + $0x1], 0 }
   0x5   :  { %11 = vsyncpa [#allocation5], 0  ;;  %s787_s12 = smov 0   ;;  %s789_s13 = smov 0  }
   0x6   :  { %s791_s14 = smov 0   ;;  %s793_s15 = smov 0  }
   0x7   :  { %s795_s16 = smov 0   ;;  %s797_s17 = smov 0  }
   0x8   :  { %s799_s18 = smov 0   ;;  %s801_s19 = smov 0  }
   0x9 LB: > { %1011 = sst [smem:[#allocation8_spill]] %s761_s19  ;;  %s525_s20 = sadd.s32 4294967295, %s761_s19   ;;  %s761_s19 = sphi %s801_s19, %s17_s19   ;;  %s757_s18 = sphi %s799_s18, %s1029_s18   ;;  %s753_s17 = sphi %s797_s17, %s1028_s17   ;;  %s749_s16 = sphi %s795_s16, %s1027_s16   ;;  %s745_s15 = sphi %s793_s15, %s1026_s15   ;;  %s741_s14 = sphi %s791_s14, %s1025_s14   ;;  %s737_s13 = sphi %s789_s13, %s1024_s13   ;;  %s733_s12 = sphi %s787_s12, %s1023_s12  }
   0xa   : > { %p45_p0 = scmp.ne.s32.totalorder %s741_s14, %s737_s13  ;;  %p46_p1 = scmp.eq.s32.totalorder %s761_s19, 0 }
   0xb   : > { %p51_p2 = scmp.ne.s32.totalorder %s737_s13, %s733_s12  ;;  %p831_p3 = scmp.eq.s32.totalorder %s525_s20, 0 }
   0xc   : > { %p835_p4 = por %p46_p1, %p45_p0  ;;  %p527_p5 = scmp.ge.s32.totalorder %s761_s19, 1 }
   0xd   : > { %p842_p6 = por %p831_p3, %p51_p2  ;;  %p132_p7 = scmp.lt.s32.totalorder %s761_s19, 5 }
   0xe   : > { %s1015_s1 = sld [smem:[#allocation10_spill]]  ;;  %s763_s29 = smov [#allocation4]  }
   0xf   : > { %p850_p8 = pnand %p527_p5, %p132_p7  ;;  %s146_s30 = sshll.u32 %s763_s29, 4  ;;  %s147_s30 = int_to_ptr.vmem [resolvable:$true] %s146_s30 }
  0x10   : > { %p556_p10 = scmp.lt.s32.totalorder %s761_s19, 4  ;;  %s26_s5 = sadd.s32 1, %s753_s17 }
  0x11   : > { %p547_p9 = pneg %p850_p8  ;;  %s29_s6 = sadd.s32 1, %s757_s18 }
  0x12   : > { %p861_p12 = pnand %p556_p10, %p835_p4  ;;  %p27_p13 = scmp.ge.s32.totalorder %s26_s5, 2 }
  0x13   : > { %p548_p11 = pnand %p547_p9, %p831_p3  ;;  %s160_s7 = sand.u32 1, %s741_s14  }
  0x14   : > { %s144_s27 = sshll.u32 %s1015_s1, 4  ;;  %s538_s8 = smul.u32 96, %s160_s7  ;;  %s145_s27 = int_to_ptr.hbm [resolvable:$true] %s144_s27 }
  0x15   : > { %550 = dma.hbm_to_vmem [thread:$0]  (!%p548_p11), %s145_s27, 16, %s147_s30, [#allocation5]  }
  0x16   : > { %s1031_s5 = smov (%p27_p13, %s26_s5), 0  ;;  %s1033_s6 = smov (!%p27_p13, %s29_s6), %s757_s18 }
  0x17   : > { %1018 = sst [smem:[#allocation9_spill]] %s1031_s5  ;;  %s34_s9 = ssub.s32 %s753_s17, %s1031_s5 }
  0x18   : > { %p31_p0 = scmp.ge.s32.totalorder %s1033_s6, 2  ;;  %s539_s10 = smul.u32 24, %s757_s18 }
  0x19   : > { %s164_s11 = scalar_lea.vmem [#allocation2], %s538_s8  ;;  %s1019_s1 = sadd.s32 1, %s741_s14 }
  0x1a   : > { %s173_s12 = sshll.u32 %s164_s11, 4  ;;  %s1035_s6 = smov (%p31_p0, %s1033_s6), 0  ;;  %s174_s12 = int_to_ptr.vmem [resolvable:$true] %s173_s12 }
  0x1b   : > { %s168_s20 = sadd.s32 %s753_s17, %s539_s10  ;;  %s33_s23 = ssub.s32 %s757_s18, %s1035_s6 }
  0x1c   : > { %s530_s25 = sshll.u32 %s168_s20, 3  ;;  %s35_s26 = sor.u32 %s34_s9, %s33_s23 }
  0x1d   : > { %s170_s30 = scalar_lea.hbm %s1003_s0, %s530_s25  ;;  %p36_p1 = scmp.eq.s32.totalorder %s35_s26, 0 }
  0x1e   : > { %s171_s21 = sshll.u32 %s170_s30, 4  ;;  %s161_s8 = scalar_lea.sflag [#allocation3], %s160_s7  ;;  %s172_s21 = int_to_ptr.hbm [resolvable:$true] %s171_s21 }
  0x1f   : > { %s885_s5 = scalar_select %p36_p1, %s741_s14, %s1019_s1  }
  0x20   : > { %s764_s11 = smov 256   ;;  %s765_s19 = smov 128  }
  0x21   : > { %s766_s3 = smov 8   ;;  %185 = sbr.rel (%p850_p8) target bundleno = 431 (0x1af), region = 32 }
  0x22   : > { %554 = dma.hbm_to_vmem [thread:$0]  (!%p861_p12), %s172_s21, 1536, %s174_s12, %s161_s8, %s764_s11, %s765_s19, %s766_s3  }
  0x23   : > { %s187_s9 = sand.u32 (!%p850_p8), 1, %s737_s13  }
  0x24   : > { %s540_s10 = smul.u32 (!%p850_p8), 96, %s187_s9  ;;  %s188_s20 = scalar_lea.sflag (!%p850_p8), [#allocation3], %s187_s9 }
  0x26   : > { %s191_s23 = scalar_lea.vmem [#allocation2], %s540_s10 }
  0x27   : > { %724 = dma.done.wait (%p842_p6), %s188_s20, 1536  }
  0x28   : > { %726 = vsyncadd (%p842_p6), %s188_s20, 4294965760 }
  0x29   : > { %728 = dma.done.wait (%p831_p3), [#allocation5], 16  }
  0x2a   : > { %730 = vsyncadd (%p831_p3), [#allocation5], 4294967280  ;;  %v234_v0 = vld [vmem:[%s191_s23] sm:$0xff]  ;;  %v235_v1 = vld [vmem:[%s191_s23 + $0x8] sm:$0xff]  ;;  %s533_s1 = sshll.u32 %s745_s15, 4  ;;  %p225_p2 = scmp.lt.s32.totalorder %s749_s16, 1 }
  0x2b   : > { %v236_v2 = vld [vmem:[%s191_s23 + $0x10] sm:$0xff]  ;;  %v246_v3 = vadd.f32 %v235_v1, %v234_v0  ;;  %v237_v4 = vld [vmem:[%s191_s23 + $0x18] sm:$0xff]  ;;  %v238_v6 = vld [vmem:[%s191_s23 + $0x20] sm:$0xff]  ;;  %p227_p3 = scmp.lt.s32.totalorder %s533_s1, 31  ;;  %s1020_s15 = sld [smem:[#allocation11_spill]]  ;;  %vm401_vm3 = vcmask 785408  }
  0x2c   : > { %v239_v8 = vld [vmem:[%s191_s23 + $0x28] sm:$0xff]  ;;  %v240_v10 = vld [vmem:[%s191_s23 + $0x30] sm:$0xff]  ;;  %v241_v12 = vld [vmem:[%s191_s23 + $0x38] sm:$0xff]  ;;  %s1037_s16 = smov (!%p225_p2, %s749_s16), 1 }
  0x2d   : > { %v247_v5 = vadd.f32 %v246_v3, %v236_v2  ;;  %v242_v14 = vld [vmem:[%s191_s23 + $0x40] sm:$0xff]  ;;  %v243_v16 = vld [vmem:[%s191_s23 + $0x48] sm:$0xff]  ;;  %v244_v18 = vld [vmem:[%s191_s23 + $0x50] sm:$0xff]  ;;  %s1039_s1 = smov (!%p227_p3, %s533_s1), 31  ;;  %s534_s3 = sshll.u32 %s1037_s16, 5 }
  0x2e   : > { %v245_v20 = vld [vmem:[%s191_s23 + $0x58] sm:$0xff]  ;;  %s230_s19 = sadd.s32 %s534_s3, %s1039_s1 }
  0x2f   : > { %v248_v7 = vadd.f32 %v247_v5, %v237_v4  ;;  %s535_s21 = sshll.u32 %s230_s19, 3 }
  0x31   : > { %v249_v9 = vadd.f32 %v248_v7, %v238_v6  ;;  %s914_s7 = scalar_lea.vmem %s1020_s15, %s535_s21 }
  0x33   : > { %v250_v11 = vadd.f32 %v249_v9, %v239_v8 }
  0x35   : > { %v251_v13 = vadd.f32 %v250_v11, %v240_v10 }
  0x37   : > { %v252_v15 = vadd.f32 %v251_v13, %v241_v12 }
  0x39   : > { %v253_v17 = vadd.f32 %v252_v15, %v242_v14 }
  0x3b   : > { %v254_v19 = vadd.f32 %v253_v17, %v243_v16 }
  0x3d   : > { %v255_v21 = vadd.f32 %v254_v19, %v244_v18 }
  0x3f   : > { %v256_v22 = vadd.f32 %v255_v21, %v245_v20 }
  0x41   : > { %v257_v23 = vrot.slane %v256_v22, 4 }
  0x43   : > { %v258_v24 = vadd.f32 %v257_v23, %v256_v22 }
  0x45   : > { %v259_v25 = vrot.slane %v258_v24, 2 }
  0x47   : > { %v260_v26 = vadd.f32 %v259_v25, %v258_v24 }
  0x49   : > { %v261_v27 = vrot.slane %v260_v26, 1 }
  0x4b   : > { %v262_v28 = vadd.f32 %v261_v27, %v260_v26 }
  0x4d   : > { %v263_v29 = vmul.f32 0.010416667, %v262_v28  ;;  %v903_v28 = vld [vmem:[#allocation4] ss:$0 sm:$0xff] }
  0x4f   : > { %v264_v30 = vsub.f32 %v234_v0, %v263_v29  ;;  %v265_v31 = vsub.f32 %v235_v1, %v263_v29  ;;  %v266_v32 = vsub.f32 %v236_v2, %v263_v29  ;;  %v267_v33 = vsub.f32 %v237_v4, %v263_v29 }
  0x50   : > { %v268_v36 = vsub.f32 %v238_v6, %v263_v29  ;;  %v269_v38 = vsub.f32 %v239_v8, %v263_v29  ;;  %v270_v41 = vsub.f32 %v240_v10, %v263_v29  ;;  %v271_v44 = vsub.f32 %v241_v12, %v263_v29 }
  0x51   : > { %v276_v34 = vmul.f32 %v264_v30, %v264_v30  ;;  %v277_v35 = vmul.f32 %v265_v31, %v265_v31  ;;  %v278_v37 = vmul.f32 %v266_v32, %v266_v32  ;;  %v279_v39 = vmul.f32 %v267_v33, %v267_v33 }
  0x52   : > { %v280_v42 = vmul.f32 %v268_v36, %v268_v36  ;;  %v281_v45 = vmul.f32 %v269_v38, %v269_v38  ;;  %v272_v47 = vsub.f32 %v242_v14, %v263_v29  ;;  %v282_v48 = vmul.f32 %v270_v41, %v270_v41 }
  0x53   : > { %v288_v40 = vadd.f32 %v277_v35, %v276_v34  ;;  %v273_v50 = vsub.f32 %v243_v16, %v263_v29  ;;  %v283_v51 = vmul.f32 %v271_v44, %v271_v44  ;;  %v274_v53 = vsub.f32 %v244_v18, %v263_v29 }
  0x54   : > { %v284_v54 = vmul.f32 %v272_v47, %v272_v47  ;;  %v275_v56 = vsub.f32 %v245_v20, %v263_v29  ;;  %v908_v29 = vld [vmem:[%s1005_s2] ss:$0 sm:$0xff] }
  0x55   : > { %v289_v43 = vadd.f32 %v288_v40, %v278_v37  ;;  %v285_v57 = vmul.f32 %v273_v50, %v273_v50  ;;  %v286_v59 = vmul.f32 %v274_v53, %v274_v53 }
  0x56   : > { %v287_v61 = vmul.f32 %v275_v56, %v275_v56 }
  0x57   : > { %v290_v46 = vadd.f32 %v289_v43, %v279_v39 }
  0x59   : > { %v291_v49 = vadd.f32 %v290_v46, %v280_v42 }
  0x5b   : > { %v292_v52 = vadd.f32 %v291_v49, %v281_v45 }
  0x5d   : > { %v293_v55 = vadd.f32 %v292_v52, %v282_v48 }
  0x5f   : > { %v294_v58 = vadd.f32 %v293_v55, %v283_v51 }
  0x61   : > { %v295_v60 = vadd.f32 %v294_v58, %v284_v54 }
  0x63   : > { %v296_v62 = vadd.f32 %v295_v60, %v285_v57 }
  0x65   : > { %v297_v63 = vadd.f32 %v296_v62, %v286_v59 }
  0x67   : > { %v298_v0 = vadd.f32 %v297_v63, %v287_v61 }
  0x69   : > { %v299_v1 = vrot.slane %v298_v0, 4 }
  0x6b   : > { %v300_v2 = vadd.f32 %v299_v1, %v298_v0 }
  0x6d   : > { %v301_v3 = vrot.slane %v300_v2, 2 }
  0x6f   : > { %v302_v4 = vadd.f32 %v301_v3, %v300_v2 }
  0x71   : > { %v303_v5 = vrot.slane %v302_v4, 1 }
  0x73   : > { %v304_v6 = vadd.f32 %v303_v5, %v302_v4 }
  0x75   : > { %v305_v7 = vmul.f32 0.010416667, %v304_v6 }
  0x77   : > { %v306_v8 = vadd.f32 1e-05, %v305_v7 }
  0x79   : > { %629 = vrsqrt.f32 %v306_v8  ;;  %vm313_vm0 = vweird.f32 %v306_v8 }
  0x7f   : > { %v630_v9 = vpop.eup %629 }
  0x80   : > { %v308_v10 = vmul.f32 %v630_v9, %v306_v8  ;;  %vm314_vm1 = vweird.f32 %v630_v9 }
  0x81   : > { %vm315_vm2 = vmor %vm313_vm0, %vm314_vm1 }
  0x82   : > { %v309_v11 = vmul.f32 %v630_v9, %v308_v10 }
  0x84   : > { %v310_v12 = vmul.f32 0.5, %v309_v11 }
  0x86   : > { %v311_v13 = vsub.f32 1.5, %v310_v12 }
  0x88   : > { %v312_v14 = vmul.f32 %v630_v9, %v311_v13 }
  0x8a   : > { %v316_v15 = vsel %vm315_vm2, %v630_v9, %v312_v14 }
  0x8b   : > { %v317_v16 = vmul.f32 %v316_v15, %v264_v30  ;;  %v318_v17 = vmul.f32 %v316_v15, %v265_v31  ;;  %v319_v18 = vmul.f32 %v316_v15, %v266_v32  ;;  %v320_v19 = vmul.f32 %v316_v15, %v267_v33 }
  0x8c   : > { %v321_v20 = vmul.f32 %v316_v15, %v268_v36  ;;  %v322_v21 = vmul.f32 %v316_v15, %v269_v38  ;;  %v323_v22 = vmul.f32 %v316_v15, %v270_v41  ;;  %v324_v23 = vmul.f32 %v316_v15, %v271_v44 }
  0x8d   : > { %329 = vxpose.xlu0.b32.start [1/12] (short) %v317_v16, 128  ;;  %v325_v24 = vmul.f32 %v316_v15, %v272_v47  ;;  %v326_v25 = vmul.f32 %v316_v15, %v273_v50  ;;  %v327_v26 = vmul.f32 %v316_v15, %v274_v53  ;;  %v328_v27 = vmul.f32 %v316_v15, %v275_v56 }
  0x95   : > { %330 = vxpose.xlu0.b32.cont [2/12] (short) %v318_v17, 128 }
  0x9d   : > { %331 = vxpose.xlu0.b32.cont [3/12] (short) %v319_v18, 128 }
  0xa5   : > { %332 = vxpose.xlu0.b32.cont [4/12] (short) %v320_v19, 128 }
  0xad   : > { %333 = vxpose.xlu0.b32.cont [5/12] (short) %v321_v20, 128 }
  0xb5   : > { %334 = vxpose.xlu0.b32.cont [6/12] (short) %v322_v21, 128 }
  0xbd   : > { %335 = vxpose.xlu0.b32.cont [7/12] (short) %v323_v22, 128 }
  0xc5   : > { %336 = vxpose.xlu0.b32.cont [8/12] (short) %v324_v23, 128 }
  0xcd   : > { %337 = vxpose.xlu0.b32.cont [9/12] (short) %v325_v24, 128 }
  0xd5   : > { %338 = vxpose.xlu0.b32.cont [10/12] (short) %v326_v25, 128 }
  0xdd   : > { %339 = vxpose.xlu0.b32.cont [11/12] (short) %v327_v26, 128 }
  0xe5   : > { %340 = vxpose.xlu0.b32.end [12/12] (short) %v328_v27, 128 }
 0x131   : > { %v345_v30 = vpop.trf.xlu0 }
 0x132   : > { %v365_v31 = vmul.f32 %v903_v28, %v345_v30 }
 0x134   : > { %v385_v32 = vadd.f32 %v908_v29, %v365_v31 }
 0x136   : > { %402 = vst.msk [vmem:[%s914_s7] sm:$0xff] %vm401_vm3, %v385_v32 }
 0x139   : > { %v346_v33 = vpop.trf.xlu0 }
 0x13a   : > { %v366_v34 = vmul.f32 %v903_v28, %v346_v33 }
 0x13c   : > { %v386_v35 = vadd.f32 %v908_v29, %v366_v34 }
 0x13e   : > { %403 = vst.msk [vmem:[%s914_s7 + $0x8] sm:$0xff] %vm401_vm3, %v386_v35 }
 0x141   : > { %v347_v36 = vpop.trf.xlu0 }
 0x142   : > { %v367_v37 = vmul.f32 %v903_v28, %v347_v36 }
 0x144   : > { %v387_v38 = vadd.f32 %v908_v29, %v367_v37 }
 0x146   : > { %404 = vst.msk [vmem:[%s914_s7 + $0x10] sm:$0xff] %vm401_vm3, %v387_v38 }
 0x149   : > { %v348_v39 = vpop.trf.xlu0 }
 0x14a   : > { %v368_v40 = vmul.f32 %v903_v28, %v348_v39 }
 0x14c   : > { %v388_v41 = vadd.f32 %v908_v29, %v368_v40 }
 0x14e   : > { %405 = vst.msk [vmem:[%s914_s7 + $0x18] sm:$0xff] %vm401_vm3, %v388_v41 }
 0x151   : > { %v349_v42 = vpop.trf.xlu0 }
 0x152   : > { %v369_v43 = vmul.f32 %v903_v28, %v349_v42 }
 0x154   : > { %v389_v44 = vadd.f32 %v908_v29, %v369_v43 }
 0x156   : > { %406 = vst.msk [vmem:[%s914_s7 + $0x20] sm:$0xff] %vm401_vm3, %v389_v44 }
 0x159   : > { %v350_v45 = vpop.trf.xlu0 }
 0x15a   : > { %v370_v46 = vmul.f32 %v903_v28, %v350_v45 }
 0x15c   : > { %v390_v47 = vadd.f32 %v908_v29, %v370_v46 }
 0x15e   : > { %407 = vst.msk [vmem:[%s914_s7 + $0x28] sm:$0xff] %vm401_vm3, %v390_v47 }
 0x161   : > { %v351_v48 = vpop.trf.xlu0 }
 0x162   : > { %v371_v49 = vmul.f32 %v903_v28, %v351_v48 }
 0x164   : > { %v391_v50 = vadd.f32 %v908_v29, %v371_v49 }
 0x166   : > { %408 = vst.msk [vmem:[%s914_s7 + $0x30] sm:$0xff] %vm401_vm3, %v391_v50 }
 0x169   : > { %v352_v51 = vpop.trf.xlu0 }
 0x16a   : > { %v372_v52 = vmul.f32 %v903_v28, %v352_v51 }
 0x16c   : > { %v392_v53 = vadd.f32 %v908_v29, %v372_v52 }
 0x16e   : > { %409 = vst.msk [vmem:[%s914_s7 + $0x38] sm:$0xff] %vm401_vm3, %v392_v53 }
 0x171   : > { %v353_v54 = vpop.trf.xlu0 }
 0x172   : > { %v373_v55 = vmul.f32 %v903_v28, %v353_v54 }
 0x174   : > { %v393_v56 = vadd.f32 %v908_v29, %v373_v55 }
 0x176   : > { %410 = vst.msk [vmem:[%s914_s7 + $0x40] sm:$0xff] %vm401_vm3, %v393_v56 }
 0x179   : > { %v354_v57 = vpop.trf.xlu0 }
 0x17a   : > { %v374_v58 = vmul.f32 %v903_v28, %v354_v57 }
 0x17c   : > { %v394_v59 = vadd.f32 %v908_v29, %v374_v58 }
 0x17e   : > { %411 = vst.msk [vmem:[%s914_s7 + $0x48] sm:$0xff] %vm401_vm3, %v394_v59 }
 0x181   : > { %v355_v60 = vpop.trf.xlu0 }
 0x182   : > { %v375_v61 = vmul.f32 %v903_v28, %v355_v60 }
 0x184   : > { %v395_v62 = vadd.f32 %v908_v29, %v375_v61 }
 0x186   : > { %412 = vst.msk [vmem:[%s914_s7 + $0x50] sm:$0xff] %vm401_vm3, %v395_v62 }
 0x189   : > { %v356_v63 = vpop.trf.xlu0 }
 0x18a   : > { %v376_v0 = vmul.f32 %v903_v28, %v356_v63 }
 0x18c   : > { %v396_v1 = vadd.f32 %v908_v29, %v376_v0 }
 0x18e   : > { %413 = vst.msk [vmem:[%s914_s7 + $0x58] sm:$0xff] %vm401_vm3, %v396_v1 }
 0x191   : > { %v357_v2 = vpop.trf.xlu0 }
 0x192   : > { %v377_v3 = vmul.f32 %v903_v28, %v357_v2 }
 0x194   : > { %v397_v4 = vadd.f32 %v908_v29, %v377_v3 }
 0x196   : > { %414 = vst.msk [vmem:[%s914_s7 + $0x60] sm:$0xff] %vm401_vm3, %v397_v4 }
 0x199   : > { %v358_v5 = vpop.trf.xlu0 }
 0x19a   : > { %v378_v6 = vmul.f32 %v903_v28, %v358_v5 }
 0x19c   : > { %v398_v7 = vadd.f32 %v908_v29, %v378_v6 }
 0x19e   : > { %415 = vst.msk [vmem:[%s914_s7 + $0x68] sm:$0xff] %vm401_vm3, %v398_v7 }
 0x1a1   : > { %v359_v8 = vpop.trf.xlu0 }
 0x1a2   : > { %v379_v9 = vmul.f32 %v903_v28, %v359_v8 }
 0x1a4   : > { %v399_v10 = vadd.f32 %v908_v29, %v379_v9 }
 0x1a6   : > { %416 = vst.msk [vmem:[%s914_s7 + $0x70] sm:$0xff] %vm401_vm3, %v399_v10 }
 0x1a9   : > { %v360_v11 = vpop.trf.xlu0 }
 0x1aa   : > { %v380_v12 = vmul.f32 %v903_v28, %v360_v11 }
 0x1ac   : > { %v400_v13 = vadd.f32 %v908_v29, %v380_v12 }
 0x1ae   : > { %417 = vst.msk [vmem:[%s914_s7 + $0x78] sm:$0xff] %vm401_vm3, %v400_v13 }
 0x1af PF: > { %s1021_s16 = sld [smem:[#allocation8_spill]]  ;;  %s1023_s12 = smov %s737_s13 }
 0x1b0   : > { %s1022_s25 = sld [smem:[#allocation9_spill]]  ;;  %s1024_s13 = smov %s741_s14 }
 0x1b1   : > { %s1025_s14 = smov %s885_s5  ;;  %s1026_s15 = smov %s753_s17 }
 0x1b5   : > { %s17_s19 = sadd.s32 1, %s1021_s16   ;;  %s1027_s16 = smov %s757_s18 }
 0x1b6   : > { %p14_p4 = scmp.ge.s32.totalorder %s17_s19, 6   ;;  %s1028_s17 = smov %s1022_s25 }
 0x1b7   : > { %s1029_s18 = smov %s1035_s6 }
 0x1b8   :  { %16 = sbr.rel (!%p14_p4) target bundleno = 9 (0x9), region = 76 }
 0x1bd   :  { %448 = vsyncpa [#allocation3], 1 }
 0x1be   :  { %450 = vsyncpa [#allocation3 + $0x1], 1 }
 0x1bf   :  { %451 = vsyncpa [#allocation5], 1 }

</bundles_post_ra>
